<compile_context>
chip_gen: v7x
topology: tpu7x:2x2x1
jax: 0.10.0
libtpu: 0.0.40
codegen_flags: <defaults>
</compile_context>

<pallas_src>
import functools

import jax
import jax.numpy as jnp
from jax.experimental import pallas as pl
from jax.experimental.pallas import tpu as pltpu


def _lim_kernel(a_ref, b_ref, out_a_ref, out_b_ref, *, mxu_dtype, safe_b_softmax):
    A = a_ref[...]                                  # (Bt, La, D) f32
    B = b_ref[...]                                  # (Bt, Lb, D) f32
    Bt, La, D = A.shape
    out_dtype = out_a_ref.dtype

    # MXU operands (cast at point of use; no-op when mxu_dtype is None).
    Am = A if mxu_dtype is None else A.astype(mxu_dtype)
    Bm = B if mxu_dtype is None else B.astype(mxu_dtype)

    # score[b,l,m] = A[b,l,:] . B[b,m,:]  (rhs-transposed contraction fed to the MXU,
    # f32 accumulation, no materialized B^T).
    s = jnp.einsum("bld,bmd->blm", Am, Bm,
                   preferred_element_type=jnp.float32)              # (Bt, La, Lb) f32

    # ---- A path: softmax over the Lb axis, denominator folded into a post-matmul
    # per-row scale (exact reciprocal; the (La,Lb) exp matrix is never normalized).
    m_a = jnp.max(s, axis=2, keepdims=True)                         # (Bt, La, 1)
    e_a = jnp.exp(s - m_a)                                          # (Bt, La, Lb) f32
    sum_a = jnp.sum(e_a, axis=2, keepdims=True)                     # (Bt, La, 1) f32
    e_am = e_a if mxu_dtype is None else e_a.astype(mxu_dtype)
    a_num = jnp.einsum("blm,bmd->bld", e_am, Bm,
                       preferred_element_type=jnp.float32)          # (Bt, La, D) f32
    A_t = a_num * (1.0 / sum_a)                                     # exact, f32

    # ---- B path: softmax over the La axis.
    if safe_b_softmax:
        # Exact per-column max subtraction (second exp) for extreme dynamic ranges.
        m_b = jnp.max(s, axis=1, keepdims=True)                     # (Bt, 1, Lb)
        e_b = jnp.exp(s - m_b)                                      # (Bt, La, Lb) f32
        e_bm = e_b if mxu_dtype is None else e_b.astype(mxu_dtype)
        lhs_a = Am
        lhs_ones = jnp.ones((Bt, La, 1), dtype=Am.dtype)
    else:
        # Single-exp path: exp(s - m_glob) = e_a * exp(m_a - m_glob); the per-row
        # rescale is folded into the A operand so no second (La,Lb) exp / temporary.
        m_glob = jnp.max(m_a, axis=1, keepdims=True)                # (Bt, 1, 1)
        row_scale = jnp.exp(m_a - m_glob)                           # (Bt, La, 1) f32
        e_bm = e_am
        lhs_a = (row_scale * A)                                     # f32 scaling
        lhs_a = lhs_a if mxu_dtype is None else lhs_a.astype(mxu_dtype)
        lhs_ones = row_scale if mxu_dtype is None else row_scale.astype(mxu_dtype)

    # lhs-transposed contraction (no materialized score^T); the column sum is an MXU
    # matvec with the same contraction so it lands directly in (Lb, 1) layout.
    # TODO(synk): check with pl.lower_as_mlir that this contraction does not insert a
    # vxpose of the (La,Lb) tile on Mosaic; if it does, restructure per-tile.
    b_num = jnp.einsum("blm,bld->bmd", e_bm, lhs_a,
                       preferred_element_type=jnp.float32)          # (Bt, Lb, D) f32
    sum_b = jnp.einsum("blm,bld->bmd", e_bm, lhs_ones,
                       preferred_element_type=jnp.float32)          # (Bt, Lb, 1) f32
    B_t = b_num * (1.0 / sum_b)                                     # exact, f32

    # ---- Output slabs (all slab math in f32).
    def write(out_ref, X, X_t):
        if D % 128 == 0:
            # Already lane-dense: four direct unmasked slab stores.
            out_ref[:, :, 0 * D:1 * D] = X.astype(out_dtype)
            out_ref[:, :, 1 * D:2 * D] = X_t.astype(out_dtype)
            out_ref[:, :, 2 * D:3 * D] = (X - X_t).astype(out_dtype)
            out_ref[:, :, 3 * D:4 * D] = (X * X_t).astype(out_dtype)
        else:
            # Lane-concatenate in registers and store once -> one lane-dense store
            # instead of four masked sub-128-lane stores.
            out_ref[...] = jnp.concatenate(
                [X, X_t, X - X_t, X * X_t], axis=-1).astype(out_dtype)

    write(out_a_ref, A, A_t)
    write(out_b_ref, B, B_t)


def _per_step_vmem_bytes(Bt, La, Lb, D, itemsize, mxu_itemsize):
    """Rough upper bound on per-grid-step VMEM (double-buffered I/O + temporaries)."""
    io = 2 * itemsize * Bt * (La * D + Lb * D + La * 4 * D + Lb * 4 * D)
    f32_tmp = 4 * Bt * (3 * La * Lb + 2 * La * D + 2 * Lb * D
                        + La * 4 * D + Lb * 4 * D + 4 * (La + Lb))
    lp_tmp = mxu_itemsize * Bt * (La * Lb + 2 * La * D + Lb * D)
    return io + f32_tmp + lp_tmp


def local_inference_modeling(A, B, *, mxu_dtype=jnp.bfloat16, safe_b_softmax=False):
    """Pallas implementation of LocalInferenceModeling.forward(A, B).

    mxu_dtype: dtype of the MXU operands (default bf16; f32 accumulation and f32
    elementwise math are always kept).  Use mxu_dtype=None for exact f32 matmuls.
    safe_b_softmax: use per-column max subtraction for the B-path softmax (second
    exp) instead of the single-exp global-max trick.
    """
    bsz, La, D = A.shape
    bsz_b, Lb, D_b = B.shape
    assert bsz_b == bsz and D_b == D

    itemsize = jnp.dtype(A.dtype).itemsize
    mxu_itemsize = itemsize if mxu_dtype is None else jnp.dtype(mxu_dtype).itemsize

    # Generation-aware VMEM budget (v7x has only 64 MiB per TensorCore).
    try:
        vmem_cap = int(pltpu.get_tpu_info().vmem_capacity_bytes)
    except Exception:
        vmem_cap = 64 << 20  # conservative fallback (v7x per-TC VMEM)
    vmem_budget = int(0.85 * vmem_cap)
    slack = 4 << 20

    need_one = _per_step_vmem_bytes(1, La, Lb, D, itemsize, mxu_itemsize) + slack
    if need_one > vmem_budget:
        raise ValueError(
            "local_inference_modeling: a single (La=%d, Lb=%d, D=%d) block needs "
            "~%d MiB VMEM > budget %d MiB; requires the flash-style La-tiled "
            "variant (TODO(synk))." % (La, Lb, D, need_one >> 20, vmem_budget >> 20))

    # Amortize per-grid-step overhead: largest batch tile (divisor of bsz, <= 16)
    # that fits the VMEM budget.
    batch_tile = 1
    for d in range(1, bsz + 1):
        if bsz % d or d > 16:
            continue
        if _per_step_vmem_bytes(d, La, Lb, D, itemsize, mxu_itemsize) + slack <= vmem_budget:
            batch_tile = d

    out_shapes = (
        jax.ShapeDtypeStruct((bsz, La, 4 * D), A.dtype),
        jax.ShapeDtypeStruct((bsz, Lb, 4 * D), B.dtype),
    )

    grid_spec = pltpu.PrefetchScalarGridSpec(
        num_scalar_prefetch=0,
        grid=(bsz // batch_tile,),
        in_specs=[
            pl.BlockSpec((batch_tile, La, D), lambda b: (b, 0, 0)),
            pl.BlockSpec((batch_tile, Lb, D), lambda b: (b, 0, 0)),
        ],
        out_specs=[
            pl.BlockSpec((batch_tile, La, 4 * D), lambda b: (b, 0, 0)),
            pl.BlockSpec((batch_tile, Lb, 4 * D), lambda b: (b, 0, 0)),
        ],
    )

    vmem_limit = int(min(
        max(_per_step_vmem_bytes(batch_tile, La, Lb, D, itemsize, mxu_itemsize) + slack,
            32 << 20),
        vmem_budget))

    n_exp = (2 if safe_b_softmax else 1) * bsz * La * Lb + bsz * La
    cost = pl.CostEstimate(
        flops=int(6 * bsz * La * Lb * D + 2 * bsz * La * Lb + 8 * bsz * (La + Lb) * D),
        transcendentals=int(n_exp),
        bytes_accessed=int(itemsize * bsz * 5 * (La + Lb) * D),
    )

    kernel = functools.partial(_lim_kernel, mxu_dtype=mxu_dtype,
                               safe_b_softmax=safe_b_softmax)

    return pl.pallas_call(
        kernel,
        out_shape=out_shapes,
        grid_spec=grid_spec,
        compiler_params=pltpu.CompilerParams(
            dimension_semantics=("parallel",),
            vmem_limit_bytes=vmem_limit,
        ),
        cost_estimate=cost,
    )(A, B)


def _reference(A, B):
    hp = jax.lax.Precision.HIGHEST
    score = jnp.einsum("bld,bmd->blm", A, B, precision=hp)
    scoreA = jax.nn.softmax(score, axis=2)
    scoreB = jax.nn.softmax(score, axis=1)
    A_t = jnp.einsum("blm,bmd->bld", scoreA, B, precision=hp)
    B_t = jnp.einsum("blm,bld->bmd", scoreB, A, precision=hp)
    out_A = jnp.concatenate([A, A_t, A - A_t, A * A_t], axis=-1)
    out_B = jnp.concatenate([B, B_t, B - B_t, B * B_t], axis=-1)
    return out_A, out_B


if __name__ == "__main__":
    key = jax.random.PRNGKey(0)
    kA, kB = jax.random.split(key)

    batch, La, Lb, hidden = 2, 8, 8, 32
    # 1/sqrt(hidden)-scaled embeddings keep the (unscaled) A @ B^T scores in a
    # realistic O(1) softmax regime, so the bf16-MXU default can be validated
    # against the exact-f32 reference at a meaningful tolerance.
    scale = hidden ** -0.5
    A = scale * jax.random.normal(kA, (batch, La, hidden), dtype=jnp.float32)
    B = scale * jax.random.normal(kB, (batch, Lb, hidden), dtype=jnp.float32)

    ref_A, ref_B = _reference(A, B)

    # Default path: bf16 MXU operands, f32 accumulation / softmax / slab math.
    out_A, out_B = local_inference_modeling(A, B)
    jax.block_until_ready((out_A, out_B))
    assert out_A.shape == (batch, La, 4 * hidden) and out_B.shape == (batch, Lb, 4 * hidden)
    assert jnp.allclose(out_A, ref_A, atol=2e-2, rtol=2e-2)
    assert jnp.allclose(out_B, ref_B, atol=2e-2, rtol=2e-2)

    # Exact-f32 MXU path (on hardware this matches the reference to ~1e-6; the same
    # relaxed tolerance is used here to stay robust to backend matmul-precision
    # defaults in emulated runs).
    out_A32, out_B32 = local_inference_modeling(A, B, mxu_dtype=None)
    jax.block_until_ready((out_A32, out_B32))
    assert jnp.allclose(out_A32, ref_A, atol=2e-2, rtol=2e-2)
    assert jnp.allclose(out_B32, ref_B, atol=2e-2, rtol=2e-2)

    print("KERNEL_OK")
</pallas_src>

<mosaic_0001>
module attributes {stable_mosaic.version = 11 : i64} {
  func.func @_lim_kernel(%arg0: i32, %arg1: memref<2x8x32xf32, #tpu.memory_space<vmem>>, %arg2: memref<2x8x32xf32, #tpu.memory_space<vmem>>, %arg3: memref<2x8x128xf32, #tpu.memory_space<vmem>>, %arg4: memref<2x8x128xf32, #tpu.memory_space<vmem>>) attributes {dimension_semantics = [#tpu.dimension_semantics<parallel>], iteration_bounds = array<i64: 1>, scalar_prefetch = 0 : i64, scratch_operands = 0 : i64, tpu.core_type = #tpu.core_type<tc>, window_params = [{transform_indices = @transform_0, window_bounds = array<i64: 2, 8, 32>}, {transform_indices = @transform_1, window_bounds = array<i64: 2, 8, 32>}, {transform_indices = @transform_2, window_bounds = array<i64: 2, 8, 128>}, {transform_indices = @transform_3, window_bounds = array<i64: 2, 8, 128>}]} {
    %c0 = arith.constant 0 : index
    %c0_0 = arith.constant 0 : index
    %c0_1 = arith.constant 0 : index
    %0 = vector.load %arg1[%c0, %c0_0, %c0_1] : memref<2x8x32xf32, #tpu.memory_space<vmem>>, vector<2x8x32xf32>
    %c0_2 = arith.constant 0 : index
    %c0_3 = arith.constant 0 : index
    %c0_4 = arith.constant 0 : index
    %1 = vector.load %arg2[%c0_2, %c0_3, %c0_4] : memref<2x8x32xf32, #tpu.memory_space<vmem>>, vector<2x8x32xf32>
    %2 = arith.truncf %0 : vector<2x8x32xf32> to vector<2x8x32xbf16>
    %3 = arith.truncf %1 : vector<2x8x32xf32> to vector<2x8x32xbf16>
    "tpu.trace_start"() <{level = 10 : i32, message = "bld,bmd->blm"}> : () -> ()
    %cst = arith.constant dense<0.000000e+00> : vector<2x8x8xf32>
    %4 = tpu.matmul %2, %3, %cst {dimension_numbers = #tpu.dot_dimension_numbers<[2], [2], [1], [1], [0, 0, 0, 1, 1, 1], [0], [0]>} : vector<2x8x32xbf16>, vector<2x8x32xbf16>, vector<2x8x8xf32> -> vector<2x8x8xf32>
    "tpu.trace_stop"() : () -> ()
    %cst_5 = arith.constant dense<0xFF800000> : vector<2x8xf32>
    %5 = vector.multi_reduction <maximumf>, %4, %cst_5 [2] : vector<2x8x8xf32> to vector<2x8xf32>
    %6 = vector.shape_cast %5 : vector<2x8xf32> to vector<2x8x1xf32>
    %7 = vector.broadcast %6 : vector<2x8x1xf32> to vector<2x8x8xf32>
    %8 = arith.subf %4, %7 : vector<2x8x8xf32>
    %9 = math.exp %8 : vector<2x8x8xf32>
    %cst_6 = arith.constant dense<0.000000e+00> : vector<2x8xf32>
    %10 = vector.multi_reduction <add>, %9, %cst_6 [2] : vector<2x8x8xf32> to vector<2x8xf32>
    %11 = vector.shape_cast %10 : vector<2x8xf32> to vector<2x8x1xf32>
    %12 = arith.truncf %9 : vector<2x8x8xf32> to vector<2x8x8xbf16>
    "tpu.trace_start"() <{level = 10 : i32, message = "blm,bmd->bld"}> : () -> ()
    %cst_7 = arith.constant dense<0.000000e+00> : vector<2x8x32xf32>
    %13 = tpu.matmul %12, %3, %cst_7 {dimension_numbers = #tpu.dot_dimension_numbers<[2], [1], [1], [2], [0, 0, 0, 1, 1, 2], [0], [0]>} : vector<2x8x8xbf16>, vector<2x8x32xbf16>, vector<2x8x32xf32> -> vector<2x8x32xf32>
    "tpu.trace_stop"() : () -> ()
    %cst_8 = arith.constant 1.000000e+00 : f32
    %14 = vector.broadcast %cst_8 : f32 to vector<2x8x1xf32>
    %15 = arith.divf %14, %11 : vector<2x8x1xf32>
    %16 = vector.broadcast %15 : vector<2x8x1xf32> to vector<2x8x32xf32>
    %17 = arith.mulf %13, %16 : vector<2x8x32xf32>
    %cst_9 = arith.constant dense<0xFF800000> : vector<2x1xf32>
    %18 = vector.multi_reduction <maximumf>, %6, %cst_9 [1] : vector<2x8x1xf32> to vector<2x1xf32>
    %19 = vector.shape_cast %18 : vector<2x1xf32> to vector<2x1x1xf32>
    %20 = vector.broadcast %19 : vector<2x1x1xf32> to vector<2x8x1xf32>
    %21 = arith.subf %6, %20 : vector<2x8x1xf32>
    %22 = math.exp %21 : vector<2x8x1xf32>
    %23 = vector.broadcast %22 : vector<2x8x1xf32> to vector<2x8x32xf32>
    %24 = arith.mulf %23, %0 : vector<2x8x32xf32>
    %25 = arith.truncf %24 : vector<2x8x32xf32> to vector<2x8x32xbf16>
    %26 = arith.truncf %22 : vector<2x8x1xf32> to vector<2x8x1xbf16>
    "tpu.trace_start"() <{level = 10 : i32, message = "blm,bld->bmd"}> : () -> ()
    %cst_10 = arith.constant dense<0.000000e+00> : vector<2x8x32xf32>
    %27 = tpu.matmul %12, %25, %cst_10 {dimension_numbers = #tpu.dot_dimension_numbers<[1], [1], [2], [2], [0, 0, 0, 2, 1, 2], [0], [0]>} : vector<2x8x8xbf16>, vector<2x8x32xbf16>, vector<2x8x32xf32> -> vector<2x8x32xf32>
    %cst_11 = arith.constant dense<0.000000e+00> : vector<2x8x1xf32>
    %28 = tpu.matmul %12, %26, %cst_11 {dimension_numbers = #tpu.dot_dimension_numbers<[1], [1], [2], [2], [0, 0, 0, 2, 1, 2], [0], [0]>} : vector<2x8x8xbf16>, vector<2x8x1xbf16>, vector<2x8x1xf32> -> vector<2x8x1xf32>
    "tpu.trace_stop"() : () -> ()
    %cst_12 = arith.constant 1.000000e+00 : f32
    %29 = vector.broadcast %cst_12 : f32 to vector<2x8x1xf32>
    %30 = arith.divf %29, %28 : vector<2x8x1xf32>
    %31 = vector.broadcast %30 : vector<2x8x1xf32> to vector<2x8x32xf32>
    %32 = arith.mulf %27, %31 : vector<2x8x32xf32>
    %33 = arith.subf %0, %17 : vector<2x8x32xf32>
    %34 = arith.mulf %0, %17 : vector<2x8x32xf32>
    %35 = tpu.concatenate %0, %17, %33, %34 in 2 : vector<2x8x32xf32>, vector<2x8x32xf32>, vector<2x8x32xf32>, vector<2x8x32xf32> -> vector<2x8x128xf32>
    %c0_13 = arith.constant 0 : index
    %c0_14 = arith.constant 0 : index
    %c0_15 = arith.constant 0 : index
    %36 = vector.load %arg3[%c0_13, %c0_14, %c0_15] : memref<2x8x128xf32, #tpu.memory_space<vmem>>, vector<2x8x128xf32>
    tpu.vector_store %arg3[%c0_13, %c0_14, %c0_15], %35 {strides = array<i32>} : memref<2x8x128xf32, #tpu.memory_space<vmem>>, vector<2x8x128xf32>,
    %37 = arith.subf %1, %32 : vector<2x8x32xf32>
    %38 = arith.mulf %1, %32 : vector<2x8x32xf32>
    %39 = tpu.concatenate %1, %32, %37, %38 in 2 : vector<2x8x32xf32>, vector<2x8x32xf32>, vector<2x8x32xf32>, vector<2x8x32xf32> -> vector<2x8x128xf32>
    %c0_16 = arith.constant 0 : index
    %c0_17 = arith.constant 0 : index
    %c0_18 = arith.constant 0 : index
    %40 = vector.load %arg4[%c0_16, %c0_17, %c0_18] : memref<2x8x128xf32, #tpu.memory_space<vmem>>, vector<2x8x128xf32>
    tpu.vector_store %arg4[%c0_16, %c0_17, %c0_18], %39 {strides = array<i32>} : memref<2x8x128xf32, #tpu.memory_space<vmem>>, vector<2x8x128xf32>,
    return
  }
  func.func @transform_0(%arg0: i32) -> (i32, i32, i32) {
    %c0_i32 = arith.constant 0 : i32
    %c0_i32_0 = arith.constant 0 : i32
    %c0_i32_1 = arith.constant 0 : i32
    return %arg0, %c0_i32, %c0_i32_0 : i32, i32, i32
  }
  func.func @transform_1(%arg0: i32) -> (i32, i32, i32) {
    %c0_i32 = arith.constant 0 : i32
    %c0_i32_0 = arith.constant 0 : i32
    %c0_i32_1 = arith.constant 0 : i32
    return %arg0, %c0_i32, %c0_i32_0 : i32, i32, i32
  }
  func.func @transform_2(%arg0: i32) -> (i32, i32, i32) {
    %c0_i32 = arith.constant 0 : i32
    %c0_i32_0 = arith.constant 0 : i32
    %c0_i32_1 = arith.constant 0 : i32
    return %arg0, %c0_i32, %c0_i32_0 : i32, i32, i32
  }
  func.func @transform_3(%arg0: i32) -> (i32, i32, i32) {
    %c0_i32 = arith.constant 0 : i32
    %c0_i32_0 = arith.constant 0 : i32
    %c0_i32_1 = arith.constant 0 : i32
    return %arg0, %c0_i32, %c0_i32_0 : i32, i32, i32
  }
}

</mosaic_0001>

<bundles_post_ra>
// kernel: tpu_custom_call.1
= control target key start
LH: loop header
LB: loop body
LE: loop exit
PB: predicated region body
PF: predicated region fallthrough
CT: control target
= control target key end

     0   :  { %9 = vsyncpa [#allocation3], 0  ;;  %s997_s0 = inlined_call_operand.hbm [shape: f32[2,8,32], index: 0, kind: input, shape index: {}]   ;;  %s998_s1 = inlined_call_operand.hbm [shape: f32[2,8,32], index: 1, kind: input, shape index: {}]   ;;  %s999_s2 = inlined_call_operand.hbm [shape: f32[2,8,128], index: 2, kind: output, shape index: {0}]   ;;  %s1000_s3 = inlined_call_operand.hbm [shape: f32[2,8,128], index: 3, kind: output, shape index: {1}]  }
   0x1   :  { %10 = vsyncpa [#allocation6], 0 }
   0x2   :  { %11 = vsyncpa [#allocation4], 0 }
   0x3   :  { %12 = vsyncpa [#allocation9], 0  ;;  %s819_s12 = smov [#allocation2]   ;;  %s723_s16 = scalar_lea.hbm %s997_s0, 256 }
   0x4   :  { %s18_s13 = sshll.u32 %s819_s12, 4  ;;  %p724_p0 = scmp.ne.s32.totalorder %s997_s0, %s723_s16  ;;  %s19_s13 = int_to_ptr.vmem [resolvable:$true] %s18_s13 }
   0x5   :  { %p727_p1 = scmp.lt.u32.totalorder %s723_s16, %s997_s0 }
   0x7   :  { %p729_p2 = pnand %p727_p1, %p724_p0 }
   0x9   :  { %732 = shalt.err (!%p729_p2)
}
   0xa   :  { %s733_s21 = scalar_lea.vmem %s19_s13, 256  ;;  %p738_p4 = scmp.lt.s32.totalorder %s19_s13, %s19_s13 }
   0xb   :  { %p734_p3 = scmp.ne.s32.totalorder %s19_s13, %s733_s21  ;;  %p739_p5 = scmp.lt.s32.totalorder %s733_s21, %s733_s21 }
   0xd   :  { %p740_p6 = por %p739_p5, %p738_p4 }
   0xf   :  { %p741_p7 = pnand %p740_p6, %p734_p3 }
  0x11   :  { %744 = shalt.err (!%p741_p7)
}
  0x12   :  { %s820_s22 = smov 128   ;;  %s821_s23 = smov 8  }
  0x13   :  { %24 = dma.hbm_to_vmem [thread:$0]  %s997_s0, 256, %s19_s13, [#allocation3], %s820_s22, %s820_s22, %s821_s23  }
  0x14   :  { %s822_s26 = smov [#allocation5]   ;;  %s745_s30 = scalar_lea.hbm %s998_s1, 256 }
  0x15   :  { %s30_s27 = sshll.u32 %s822_s26, 4  ;;  %p746_p8 = scmp.ne.s32.totalorder %s998_s1, %s745_s30  ;;  %s31_s27 = int_to_ptr.vmem [resolvable:$true] %s30_s27 }
  0x16   :  { %p749_p9 = scmp.lt.u32.totalorder %s745_s30, %s998_s1 }
  0x18   :  { %p751_p10 = pnand %p749_p9, %p746_p8 }
  0x1a   :  { %754 = shalt.err (!%p751_p10)
}
  0x1b   :  { %s755_s8 = scalar_lea.vmem %s31_s27, 256  ;;  %p760_p12 = scmp.lt.s32.totalorder %s31_s27, %s31_s27 }
  0x1c   :  { %p756_p11 = scmp.ne.s32.totalorder %s31_s27, %s755_s8  ;;  %p761_p13 = scmp.lt.s32.totalorder %s755_s8, %s755_s8 }
  0x1e   :  { %p762_p0 = por %p761_p13, %p760_p12 }
  0x20   :  { %p763_p1 = pnand %p762_p0, %p756_p11 }
  0x22   :  { %766 = shalt.err (!%p763_p1)
}
  0x23   :  { %36 = dma.hbm_to_vmem [thread:$0]  %s998_s1, 256, %s31_s27, [#allocation6], %s820_s22, %s820_s22, %s821_s23  }
  0x24   :  { %811 = dma.done.wait [#allocation3], 256  }
  0x25   :  { %812 = vsyncadd [#allocation3], 4294967040 }
  0x26   :  { %813 = dma.done.wait [#allocation6], 256  }
  0x27   :  { %814 = vsyncadd [#allocation6], 4294967040  ;;  %v823_v0 = vmov 0.0   ;;  %vm824_vm0 = vmmov 0   ;;  %v887_v1 = vld [vmem:[#allocation5] sm:$0xff]  ;;  %vm52_vm1 = vcmask 261120  }
  0x28   :  { %645 = vmatprep.subr.bf16.mxu0 %v823_v0  ;;  %651 = vmatprep.subr.bf16.mxu1 %v823_v0  ;;  %v889_v2 = vld [vmem:[#allocation5 + $0x8] sm:$0xff]  ;;  %v50_v3 = vpack.c.bf16 %v887_v1, %v887_v1  ;;  %v897_v7 = vld [vmem:[#allocation2] sm:$0xff]  ;;  %v899_v8 = vld [vmem:[#allocation2 + $0x8] sm:$0xff]  ;;  %vm145_vm2 = vcmask 64512   ;;  %vm169_vm3 = vcmask 1043456   ;;  %s826_s1 = smov 64  }
  0x29   :  { %647 = vmatprep.mubr.msk.bf16.mxu0 %vm824_vm0, %v823_v0  ;;  %653 = vmatprep.mubr.msk.bf16.mxu1 %vm824_vm0, %v823_v0  ;;  %v51_v4 = vpack.c.bf16 %v889_v2, %v889_v2  ;;  %v48_v9 = vpack.c.bf16 %v897_v7, %v897_v7  ;;  %v49_v10 = vpack.c.bf16 %v899_v8, %v899_v8  ;;  %s827_s10 = smov 32   ;;  %s828_s11 = smov 96   ;;  %vm543_vm4 = vcmask 523264  }
  0x2a   :  { %v57_v5 = vsel %vm52_vm1, %v50_v3, 0  ;;  %v170_v21 = vsel %vm169_vm3, %v50_v3, 0  ;;  %vm546_vm5 = vcmask 785408   ;;  %s829_s12 = smov [#allocation7]  }
  0x2b   :  { %v103_v6 = vsel %vm52_vm1, %v51_v4, 0  ;;  %646 = vmatpush3.bf16.xpose.msra.mxu0 %v57_v5  ;;  %v215_v22 = vsel %vm169_vm3, %v51_v4, 0  ;;  %v825_v4 = vmov 0   ;;  %s592_s13 = sshll.u32 %s829_s12, 4  ;;  %s593_s13 = int_to_ptr.vmem [resolvable:$true] %s592_s13 }
  0x2c   :  { %652 = vmatpush3.bf16.xpose.msra.mxu1 %v103_v6  ;;  %657 = vmatprep.subr.bf16.mxu0 %v823_v0  ;;  %s767_s14 = scalar_lea.vmem %s593_s13, 256  ;;  %p772_p3 = scmp.lt.s32.totalorder %s593_s13, %s593_s13 }
  0x2d   :  { %663 = vmatprep.subr.bf16.mxu1 %v823_v0  ;;  %705 = vset.pattern.permute.xlu0 %v825_v4  ;;  %p768_p2 = scmp.ne.s32.totalorder %s593_s13, %s767_s14  ;;  %p773_p4 = scmp.lt.s32.totalorder %s767_s14, %s767_s14 }
  0x2f   :  { %p774_p5 = por %p773_p4, %p772_p3 }
  0x31   :  { %p775_p6 = pnand %p774_p5, %p768_p2 }
  0x32   :  { %648 = vmatmul.mubr.msk.bf16.vlgmr.msra.gmra.mrb[0].mxu0 %vm52_vm1, %v48_v9 }
  0x33   :  { %654 = vmatmul.mubr.msk.bf16.vlgmr.msra.gmra.mrb[0].mxu1 %vm52_vm1, %v49_v10  ;;  %659 = vmatprep.mubr.msk.bf16.mxu0 %vm824_vm0, %v823_v0 }
  0x34   :  { %665 = vmatprep.mubr.msk.bf16.mxu1 %vm824_vm0, %v823_v0  ;;  %658 = vmatpush3.bf16.msra.mxu0 %v170_v21 }
  0x35   :  { %669 = vmatprep.subr.bf16.mxu0 %v823_v0  ;;  %664 = vmatpush3.bf16.msra.mxu1 %v215_v22 }
  0x36   :  { %675 = vmatprep.subr.bf16.mxu1 %v823_v0 }
 0x105   :  { %v93_v11 = vpop.f32.mrb[0].mxu0 }
 0x106   :  { %v139_v12 = vpop.f32.mrb[0].mxu1  ;;  %v649_v13 = vpop.f32.mrb[1].mxu0  ;;  %v146_v15 = vsel %vm145_vm2, %v93_v11, -inf }
 0x107   :  { %v655_v14 = vpop.f32.mrb[1].mxu1  ;;  %147 = vmax.xlane.f32.xlu0 %v146_v15  ;;  %v96_v16 = vpop.f32.mrb[2].mxu0  ;;  %v149_v20 = vsel %vm145_vm2, %v139_v12, -inf }
 0x108   :  { %v142_v17 = vpop.f32.mrb[2].mxu1  ;;  %v650_v18 = vpop.f32.mrb[3].mxu0 }
 0x109   :  { %v656_v19 = vpop.f32.mrb[3].mxu1 }
 0x10b   :  { %150 = vmax.xlane.f32.xlu0 %v149_v20 }
 0x194   :  { %v148_v23 = vpop.xlane.xlu0 %147 }
 0x195   :  { %v152_v24 = vsub.f32 %v93_v11, %v148_v23  ;;  %v263_v25 = vrot.slane %v148_v23, 4 }
 0x197   :  { %v154_v26 = vmul.f32 1.442695, %v152_v24  ;;  %v264_v27 = vmax.f32 %v148_v23, %v263_v25 }
 0x198   :  { %v151_v28 = vpop.xlane.xlu0 %150 }
 0x199   :  { %707 = vpow2.f32 %v154_v26  ;;  %v265_v29 = vrot.slane %v264_v27, 2  ;;  %v153_v30 = vsub.f32 %v139_v12, %v151_v28  ;;  %v269_v31 = vrot.slane %v151_v28, 4 }
 0x19b   :  { %v266_v32 = vmax.f32 %v264_v27, %v265_v29  ;;  %v156_v33 = vmul.f32 1.442695, %v153_v30  ;;  %v270_v34 = vmax.f32 %v151_v28, %v269_v31 }
 0x19d   :  { %v267_v35 = vrot.slane %v266_v32, 1  ;;  %709 = vpow2.f32 %v156_v33  ;;  %v271_v36 = vrot.slane %v270_v34, 2 }
 0x19f   :  { %v268_v37 = vmax.f32 %v266_v32, %v267_v35  ;;  %v272_v38 = vmax.f32 %v270_v34, %v271_v36 }
 0x1a1   :  { %v275_v39 = vsub.f32 %v148_v23, %v268_v37  ;;  %v273_v40 = vrot.slane %v272_v38, 1 }
 0x1a3   :  { %v708_v41 = vpop.eup %707  ;;  %v277_v42 = vmul.f32 1.442695, %v275_v39  ;;  %v274_v43 = vmax.f32 %v272_v38, %v273_v40 }
 0x1a4   :  { %v158_v44 = vsel %vm145_vm2, %v708_v41, 0.0  ;;  %v164_v45 = vpack.c.bf16 %v708_v41, %v708_v41 }
 0x1a5   :  { %711 = vpow2.f32 %v277_v42  ;;  %v276_v46 = vsub.f32 %v151_v28, %v274_v43  ;;  %159 = vadd.xlane.f32.xlu0 %v158_v44 }
 0x1a6   :  { %287 = vxpose.xlu1.c.b16.start.end [1/1] (short) (narrow) %v164_v45, 16  ;;  %660 = vmatmul.mubr.msk.bf16.vlgmr.msra.gmra.mrb[4].mxu0 %vm145_vm2, %v164_v45 }
 0x1a7   :  { %v710_v47 = vpop.eup %709  ;;  %v279_v48 = vmul.f32 1.442695, %v276_v46  ;;  %671 = vmatprep.mubr.msk.bf16.mxu0 %vm824_vm0, %v823_v0 }
 0x1a8   :  { %v165_v49 = vpack.c.bf16 %v710_v47, %v710_v47  ;;  %v161_v56 = vsel %vm145_vm2, %v710_v47, 0.0 }
 0x1a9   :  { %713 = vpow2.f32 %v279_v48 }
 0x1aa   :  { %349 = vxpose.xlu1.c.b16.start.end [1/1] (short) (narrow) %v165_v49, 16  ;;  %666 = vmatmul.mubr.msk.bf16.vlgmr.msra.gmra.mrb[4].mxu1 %vm145_vm2, %v165_v49 }
 0x1ab   :  { %677 = vmatprep.mubr.msk.bf16.mxu1 %vm824_vm0, %v823_v0 }
 0x1ae   :  { %706 = vset.pattern.permute.xlu1 %v825_v4 }
 0x1af   :  { %v712_v50 = vpop.eup %711 }
 0x1b0   :  { %v281_v51 = vmul.f32 %v712_v50, %v897_v7  ;;  %v285_v59 = vpack.c.bf16 %v712_v50, %v712_v50 }
 0x1b2   :  { %v283_v52 = vpack.c.bf16 %v281_v51, %v281_v51  ;;  %v412_v61 = vsel %vm169_vm3, %v285_v59, 0 }
 0x1b3   :  { %v714_v53 = vpop.eup %713 }
 0x1b4   :  { %v307_v54 = vsel %vm169_vm3, %v283_v52, 0  ;;  %v282_v55 = vmul.f32 %v714_v53, %v899_v8  ;;  %v286_v62 = vpack.c.bf16 %v714_v53, %v714_v53 }
 0x1b5   :  { %670 = vmatpush3.bf16.msra.mxu0 %v307_v54 }
 0x1b6   :  { %v284_v57 = vpack.c.bf16 %v282_v55, %v282_v55  ;;  %681 = vmatprep.subr.bf16.mxu0 %v823_v0  ;;  %v455_v3 = vsel %vm169_vm3, %v286_v62, 0 }
 0x1b7   :  { %162 = vadd.xlane.f32.xlu1 %v161_v56 }
 0x1b8   :  { %v369_v58 = vsel %vm169_vm3, %v284_v57, 0 }
 0x1b9   :  { %676 = vmatpush3.bf16.msra.mxu1 %v369_v58 }
 0x1ba   :  { %687 = vmatprep.subr.bf16.mxu1 %v823_v0 }
 0x20c   :  { %v295_v60 = vpop.trf.xlu1 }
 0x20d   :  { %672 = vmatmul.mubr.msk.bf16.vlgmr.msra.gmra.mrb[8].mxu0 %vm145_vm2, %v295_v60 }
 0x20e   :  { %682 = vmatpush3.bf16.msra.mxu0 %v412_v61  ;;  %683 = vmatprep.mubr.msk.bf16.mxu0 %vm824_vm0, %v823_v0 }
 0x210   :  { %v357_v63 = vpop.trf.xlu1 }
 0x211   :  { %678 = vmatmul.mubr.msk.bf16.vlgmr.msra.gmra.mrb[8].mxu1 %vm145_vm2, %v357_v63 }
 0x212   :  { %688 = vmatpush3.bf16.msra.mxu1 %v455_v3  ;;  %689 = vmatprep.mubr.msk.bf16.mxu1 %vm824_vm0, %v823_v0 }
 0x215   :  { %684 = vmatmul.mubr.msk.bf16.vlgmr.msra.gmra.mrb[12].mxu0 %vm145_vm2, %v295_v60 }
 0x219   :  { %690 = vmatmul.mubr.msk.bf16.vlgmr.msra.gmra.mrb[12].mxu1 %vm145_vm2, %v357_v63 }
 0x232   :  { %v160_v27 = vpop.xlane.xlu0 %159 }
 0x244   :  { %v163_v0 = vpop.xlane.xlu1 %162 }
 0x245   :  { %715 = vrcp.f32 %v163_v0 }
 0x24f   :  { %v716_v32 = vpop.eup %715 }
 0x279   :  { %v206_v5 = vpop.f32.mrb[4].mxu0 }
 0x27a   :  { %v661_v6 = vpop.f32.mrb[5].mxu0 }
 0x27b   :  { %v209_v9 = vpop.f32.mrb[6].mxu0 }
 0x27c   :  { %v662_v10 = vpop.f32.mrb[7].mxu0 }
 0x27d   :  { %v251_v11 = vpop.f32.mrb[4].mxu1 }
 0x27e   :  { %v667_v12 = vpop.f32.mrb[5].mxu1  ;;  %v262_v33 = vmul.f32 %v716_v32, %v251_v11 }
 0x27f   :  { %v254_v13 = vpop.f32.mrb[6].mxu1 }
 0x280   :  { %v668_v14 = vpop.f32.mrb[7].mxu1  ;;  %v514_v35 = vsub.f32 %v899_v8, %v262_v33  ;;  %v516_v39 = vmul.f32 %v262_v33, %v899_v8 }
 0x2e0   :  { %v343_v15 = vpop.f32.mrb[8].mxu0 }
 0x2e1   :  { %v673_v16 = vpop.f32.mrb[9].mxu0 }
 0x2e2   :  { %v346_v17 = vpop.f32.mrb[10].mxu0 }
 0x2e3   :  { %v674_v18 = vpop.f32.mrb[11].mxu0 }
 0x2e4   :  { %v405_v19 = vpop.f32.mrb[8].mxu1 }
 0x2e5   :  { %v679_v20 = vpop.f32.mrb[9].mxu1 }
 0x2e6   :  { %v408_v21 = vpop.f32.mrb[10].mxu1 }
 0x2e7   :  { %v680_v22 = vpop.f32.mrb[11].mxu1 }
 0x2e8   :  { %v448_v23 = vpop.f32.mrb[12].mxu0 }
 0x2e9   :  { %717 = vrcp.f32 %v448_v23  ;;  %v685_v24 = vpop.f32.mrb[13].mxu0 }
 0x2ea   :  { %v451_v25 = vpop.f32.mrb[14].mxu0 }
 0x2eb   :  { %v686_v26 = vpop.f32.mrb[15].mxu0 }
 0x2ec   :  { %v491_v28 = vpop.f32.mrb[12].mxu1 }
 0x2ed   :  { %719 = vrcp.f32 %v491_v28  ;;  %v691_v29 = vpop.f32.mrb[13].mxu1 }
 0x2ee   :  { %v494_v30 = vpop.f32.mrb[14].mxu1  ;;  %721 = vrcp.f32 %v160_v27 }
 0x2ef   :  { %v692_v31 = vpop.f32.mrb[15].mxu1 }
 0x2f3   :  { %v718_v34 = vpop.eup %717 }
 0x2f4   :  { %503 = vperm.xlu0 %705, %v718_v34  }
 0x2f7   :  { %v720_v36 = vpop.eup %719 }
 0x2f8   :  { %508 = vperm.xlu1 %706, %v720_v36   ;;  %529 = vrot.lane.b32.xlu0 %v514_v35, %s826_s1  ;;  %v722_v37 = vpop.eup %721 }
 0x2f9   :  { %v261_v38 = vmul.f32 %v722_v37, %v206_v5 }
 0x2fb   :  { %v513_v40 = vsub.f32 %v897_v7, %v261_v38  ;;  %v515_v41 = vmul.f32 %v261_v38, %v897_v7 }
 0x2fc   :  { %519 = vrot.lane.b32.xlu1 %v261_v38, %s827_s10  ;;  %537 = vrot.lane.b32.xlu0 %v516_v39, %s828_s11 }
 0x300   :  { %521 = vrot.lane.b32.xlu1 %v262_v33, %s827_s10 }
 0x304   :  { %527 = vrot.lane.b32.xlu1 %v513_v40, %s826_s1 }
 0x308   :  { %535 = vrot.lane.b32.xlu1 %v515_v41, %s828_s11 }
 0x373   :  { %v504_v42 = vpop.permute.xlu0 %503 }
 0x374   :  { %v511_v43 = vmul.f32 %v504_v42, %v343_v15 }
 0x376   :  { %557 = vrot.lane.b32.xlu1 %v511_v43, %s827_s10  ;;  %v551_v49 = vsub.f32 %v887_v1, %v511_v43  ;;  %v553_v53 = vmul.f32 %v511_v43, %v887_v1 }
 0x377   :  { %v509_v44 = vpop.permute.xlu1 %508  ;;  %v530_v47 = vpop.permute.xlu0 %529 }
 0x378   :  { %v512_v45 = vmul.f32 %v509_v44, %v405_v19 }
 0x37a   :  { %559 = vrot.lane.b32.xlu1 %v512_v45, %s827_s10  ;;  %v552_v46 = vsub.f32 %v889_v2, %v512_v45  ;;  %v554_v50 = vmul.f32 %v512_v45, %v889_v2 }
 0x37b   :  { %v520_v48 = vpop.permute.xlu1 %519  ;;  %v538_v54 = vpop.permute.xlu0 %537 }
 0x37c   :  { %567 = vrot.lane.b32.xlu0 %v552_v46, %s826_s1  ;;  %v541_v58 = vsel %vm52_vm1, %v897_v7, %v520_v48 }
 0x37e   :  { %565 = vrot.lane.b32.xlu1 %v551_v49, %s826_s1 }
 0x37f   :  { %v522_v51 = vpop.permute.xlu1 %521 }
 0x380   :  { %v542_v52 = vsel %vm52_vm1, %v899_v8, %v522_v51  ;;  %575 = vrot.lane.b32.xlu0 %v554_v50, %s828_s11 }
 0x381   :  { %v545_v55 = vsel %vm543_vm4, %v542_v52, %v530_v47 }
 0x382   :  { %573 = vrot.lane.b32.xlu1 %v553_v53, %s828_s11  ;;  %v548_v56 = vsel %vm546_vm5, %v545_v55, %v538_v54 }
 0x383   :  { %v528_v57 = vpop.permute.xlu1 %527  ;;  %550 = vst [vmem:[#allocation7 + $0x8] sm:$0xff] %v548_v56 }
 0x384   :  { %v544_v59 = vsel %vm543_vm4, %v541_v58, %v528_v57 }
 0x387   :  { %v536_v60 = vpop.permute.xlu1 %535 }
 0x388   :  { %v547_v8 = vsel %vm546_vm5, %v544_v59, %v536_v60 }
 0x389   :  { %549 = vst [vmem:[#allocation7] sm:$0xff] %v547_v8 }
 0x38a   :  { %778 = shalt.err (!%p775_p6)
}
 0x38b   :  { %s779_s17 = scalar_lea.hbm %s999_s2, 256 }
 0x38c   :  { %p780_p7 = scmp.ne.s32.totalorder %s999_s2, %s779_s17  ;;  %p783_p8 = scmp.lt.u32.totalorder %s779_s17, %s999_s2 }
 0x38e   :  { %p785_p9 = pnand %p783_p8, %p780_p7 }
 0x390   :  { %788 = shalt.err (!%p785_p9)
}
 0x391   :  { %598 = dma.vmem_to_hbm [thread:$0]  %s593_s13, 256, %s999_s2, [#allocation4], %s820_s22, %s820_s22, %s821_s23  }
 0x392   :  { %s830_s26 = smov [#allocation8]  }
 0x393   :  { %s604_s27 = sshll.u32 %s830_s26, 4  ;;  %s605_s27 = int_to_ptr.vmem [resolvable:$true] %s604_s27 }
 0x394   :  { %s789_s2 = scalar_lea.vmem %s605_s27, 256  ;;  %p794_p11 = scmp.lt.s32.totalorder %s605_s27, %s605_s27 }
 0x395   :  { %p790_p10 = scmp.ne.s32.totalorder %s605_s27, %s789_s2  ;;  %p795_p12 = scmp.lt.s32.totalorder %s789_s2, %s789_s2 }
 0x397   :  { %p796_p13 = por %p795_p12, %p794_p11 }
 0x399   :  { %p797_p0 = pnand %p796_p13, %p790_p10 }
 0x3e8   :  { %v558_v7 = vpop.permute.xlu1 %557 }
 0x3e9   :  { %v579_v6 = vsel %vm52_vm1, %v887_v1, %v558_v7 }
 0x3ec   :  { %v560_v61 = vpop.permute.xlu1 %559 }
 0x3ed   :  { %v580_v63 = vsel %vm52_vm1, %v889_v2, %v560_v61 }
 0x3ee   :  { %v568_v62 = vpop.permute.xlu0 %567 }
 0x3ef   :  { %v582_v4 = vsel %vm543_vm4, %v580_v63, %v568_v62 }
 0x3f0   :  { %v566_v3 = vpop.permute.xlu1 %565 }
 0x3f1   :  { %v581_v10 = vsel %vm543_vm4, %v579_v6, %v566_v3 }
 0x3f2   :  { %v576_v5 = vpop.permute.xlu0 %575 }
 0x3f3   :  { %v584_v9 = vsel %vm546_vm5, %v582_v4, %v576_v5 }
 0x3f4   :  { %586 = vst [vmem:[#allocation8 + $0x8] sm:$0xff] %v584_v9  ;;  %v574_v11 = vpop.permute.xlu1 %573 }
 0x3f5   :  { %v583_v12 = vsel %vm546_vm5, %v581_v10, %v574_v11 }
 0x3f6   :  { %585 = vst [vmem:[#allocation8] sm:$0xff] %v583_v12 }
 0x3f7   :  { %800 = shalt.err (!%p797_p0)
}
 0x3f8   :  { %s801_s30 = scalar_lea.hbm %s1000_s3, 256 }
 0x3f9   :  { %p802_p1 = scmp.ne.s32.totalorder %s1000_s3, %s801_s30  ;;  %p805_p2 = scmp.lt.u32.totalorder %s801_s30, %s1000_s3 }
 0x3fb   :  { %p807_p3 = pnand %p805_p2, %p802_p1 }
 0x3fd   :  { %810 = shalt.err (!%p807_p3)
}
 0x3fe   :  { %610 = dma.vmem_to_hbm [thread:$0]  %s605_s27, 256, %s1000_s3, [#allocation9], %s820_s22, %s820_s22, %s821_s23  }
 0x3ff   :  { %815 = dma.done.wait [#allocation4], 256  }
 0x400   :  { %816 = vsyncadd [#allocation4], 4294967040 }
 0x401   :  { %817 = dma.done.wait [#allocation9], 256  }
 0x402   :  { %818 = vsyncadd [#allocation9], 4294967040 }
 0x403   :  { %617 = vsyncpa [#allocation3], 1 }
 0x404   :  { %618 = vsyncpa [#allocation6], 1 }
 0x405   :  { %619 = vsyncpa [#allocation4], 1 }
 0x406   :  { %620 = vsyncpa [#allocation9], 1 }

</bundles_post_ra>
